<compile_context>
chip_gen: v7x
topology: tpu7x:2x2x1
jax: 0.10.0
libtpu: 0.0.40
codegen_flags: <defaults>
</compile_context>

<pallas_src>
import jax
import jax.numpy as jnp
from jax import lax
from jax.experimental import pallas as pl
from jax.experimental.pallas import tpu as pltpu


def _largest_divisor_leq(n, cap):
    cap = max(1, min(n, cap))
    for t in range(cap, 0, -1):
        if n % t == 0:
            return t
    return 1


def additive_attention(queries, keys, values, valid_lens, w_q, w_k, w_v):
    B, Q, Dq = queries.shape
    _, K, Dk = keys.shape
    _, _, Dv = values.shape
    H = w_q.shape[1]

    # --- hoisted projections: one batched XLA matmul each ---
    qp = jnp.einsum('bqd,dh->bqh', queries, w_q).astype(jnp.float32)   # (B, Q, H)
    kp = jnp.einsum('bkd,dh->bkh', keys, w_k).astype(jnp.float32)      # (B, K, H)
    wv_row = w_v.reshape(1, H).astype(jnp.float32)                     # lane-dense (1, H)
    valid_i32 = valid_lens.astype(jnp.int32)

    # --- tile selection ---
    TB = _largest_divisor_leq(B, 8)
    if B // TB < 2:                 # keep >= 2 parallel grid steps for megacore if we can
        TB = _largest_divisor_leq(B, max(1, B // 2))
    TK = K if K <= 512 else 512     # K tile; f32 feat footprint = TB*Q*TK*H*4 bytes
    nb = B // TB
    nk = pl.cdiv(K, TK)

    def kernel(valid_ref,                        # scalar prefetch: (B,) int32 in SMEM
               qp_ref, kp_ref, v_ref, wv_ref,    # (TB,Q,H) (TB,TK,H) (TB,TK,Dv) (1,H)
               out_ref,                          # (TB,Q,Dv)
               m_sc, l_sc, acc_sc):              # (TB,Q,1) (TB,Q,1) (TB,Q,Dv) f32
        ki = pl.program_id(1)

        @pl.when(ki == 0)
        def _():
            m_sc[...] = jnp.full_like(m_sc, -jnp.inf)
            l_sc[...] = jnp.zeros_like(l_sc)
            acc_sc[...] = jnp.zeros_like(acc_sc)

        q = qp_ref[...]        # (TB, Q, H)
        k = kp_ref[...]        # (TB, TK, H)
        v = v_ref[...]         # (TB, TK, Dv)
        wv = wv_ref[...]       # (1, H)

        # features = tanh(q.unsqueeze(2) + k.unsqueeze(1)) for this K tile.
        feat = jnp.tanh(q[:, :, None, :] + k[:, None, :, :])    # (TB, Q, TK, H)
        # scores = <feat, W_v>_H as a VPU multiply + lane reduction (no N=1 MXU dot).
        scores = jnp.sum(feat * wv, axis=-1)                     # (TB, Q, TK) f32

        # masked_softmax mask: key position < valid_len (and < K for padded tiles).
        b0 = pl.program_id(0) * TB
        key_idx = ki * TK + lax.broadcasted_iota(jnp.int32, (TB, Q, TK), 2)
        batch_iota = lax.broadcasted_iota(jnp.int32, (TB, Q, TK), 0)
        valid_b = jnp.zeros((TB, Q, TK), jnp.int32)
        for t in range(TB):                       # TB is small & static
            valid_b = jnp.where(batch_iota == t, valid_ref[b0 + t], valid_b)
        mask = (key_idx < valid_b) & (key_idx < K)
        scores = jnp.where(mask, scores, jnp.float32(-1e6))

        # Online (streaming) masked softmax update.
        m_prev = m_sc[...]
        m_new = jnp.maximum(m_prev, jnp.max(scores, axis=-1, keepdims=True))
        alpha = jnp.exp(m_prev - m_new)
        p = jnp.exp(scores - m_new)                              # (TB, Q, TK)
        l_sc[...] = alpha * l_sc[...] + jnp.sum(p, axis=-1, keepdims=True)
        acc_sc[...] = alpha * acc_sc[...] + jnp.einsum(
            'bqk,bkd->bqd', p, v, preferred_element_type=jnp.float32)
        m_sc[...] = m_new

        # Dropout is identity at inference time (eval mode).
        # TODO(synk): training-mode dropout (pltpu.prng_*) not implemented.

        @pl.when(ki == pl.num_programs(1) - 1)
        def _():
            l = l_sc[...]
            inv = pl.reciprocal(l, approx=True)   # EUP seed (free slot)
            inv = inv * (2.0 - l * inv)           # one Newton step -> ~f32 accurate
            out_ref[...] = (acc_sc[...] * inv).astype(out_ref.dtype)

    grid_spec = pltpu.PrefetchScalarGridSpec(
        num_scalar_prefetch=1,
        grid=(nb, nk),
        in_specs=[
            pl.BlockSpec((TB, Q, H), lambda b, k, vl: (b, 0, 0)),
            pl.BlockSpec((TB, TK, H), lambda b, k, vl: (b, k, 0)),
            pl.BlockSpec((TB, TK, Dv), lambda b, k, vl: (b, k, 0)),
            pl.BlockSpec((1, H), lambda b, k, vl: (0, 0)),
        ],
        out_specs=pl.BlockSpec((TB, Q, Dv), lambda b, k, vl: (b, 0, 0)),
        scratch_shapes=[
            pltpu.VMEM((TB, Q, 1), jnp.float32),    # m
            pltpu.VMEM((TB, Q, 1), jnp.float32),    # l
            pltpu.VMEM((TB, Q, Dv), jnp.float32),   # acc
        ],
    )

    return pl.pallas_call(
        kernel,
        out_shape=jax.ShapeDtypeStruct((B, Q, Dv), jnp.float32),
        grid_spec=grid_spec,
        compiler_params=pltpu.CompilerParams(
            dimension_semantics=("parallel", "arbitrary"),
            vmem_limit_bytes=32 * 1024 * 1024),     # <= physical on all of v5e/v6e/v7x
    )(valid_i32, qp, kp, values.astype(jnp.float32), wv_row)


def additive_attention_ref(queries, keys, values, valid_lens, w_q, w_k, w_v):
    """Pure-JAX reference mirroring the PyTorch module (eval mode)."""
    qp = queries @ w_q              # (B, Q, H)
    kp = keys @ w_k                 # (B, K, H)
    feat = jnp.tanh(qp[:, :, None, :] + kp[:, None, :, :])   # (B, Q, K, H)
    scores = jnp.squeeze(feat @ w_v, -1)                      # (B, Q, K)
    K = scores.shape[-1]
    mask = jnp.arange(K)[None, None, :] < valid_lens[:, None, None]
    scores = jnp.where(mask, scores, -1e6)
    attn = jax.nn.softmax(scores, axis=-1)
    return attn @ values


if __name__ == "__main__":
    key = jax.random.PRNGKey(0)
    k1, k2, k3, k4, k5 = jax.random.split(key, 5)

    # Shapes from the original script:
    # queries (2,1,2), keys (2,10,2), values (2,10,4), num_hiddens=8
    B, Q, K, Dq, Dk, Dv, H = 2, 1, 10, 2, 2, 4, 8

    queries = jax.random.normal(k1, (B, Q, Dq), dtype=jnp.float32)
    keys_ = jax.random.normal(k2, (B, K, Dk), dtype=jnp.float32)
    values = jnp.tile(jnp.arange(K * Dv, dtype=jnp.float32).reshape(1, K, Dv),
                      (B, 1, 1))
    valid_lens = jnp.array([2, 6], dtype=jnp.int32)

    # Deterministic parameter init (Linear weights, no bias).
    w_q = jax.random.normal(k3, (Dq, H), dtype=jnp.float32) * 0.5
    w_k = jax.random.normal(k4, (Dk, H), dtype=jnp.float32) * 0.5
    w_v = jax.random.normal(k5, (H, 1), dtype=jnp.float32) * 0.5

    out = additive_attention(queries, keys_, values, valid_lens, w_q, w_k, w_v)
    out = jax.block_until_ready(out)

    ref = additive_attention_ref(queries, keys_, values, valid_lens, w_q, w_k, w_v)
    assert out.shape == (B, Q, Dv)
    assert jnp.allclose(out, ref, atol=1e-4, rtol=1e-3), (out, ref)

    print("KERNEL_OK")
</pallas_src>

<mosaic_0001>
module attributes {stable_mosaic.version = 11 : i64} {
  func.func @kernel(%arg0: i32, %arg1: i32, %arg2: memref<2xi32, #tpu.memory_space<smem>>, %arg3: memref<1x1x8xf32, #tpu.memory_space<vmem>>, %arg4: memref<1x10x8xf32, #tpu.memory_space<vmem>>, %arg5: memref<1x10x4xf32, #tpu.memory_space<vmem>>, %arg6: memref<1x8xf32, #tpu.memory_space<vmem>>, %arg7: memref<1x1x4xf32, #tpu.memory_space<vmem>>, %arg8: memref<1x1x1xf32, #tpu.memory_space<vmem>>, %arg9: memref<1x1x1xf32, #tpu.memory_space<vmem>>, %arg10: memref<1x1x4xf32, #tpu.memory_space<vmem>>) attributes {dimension_semantics = [#tpu.dimension_semantics<parallel>, #tpu.dimension_semantics<arbitrary>], iteration_bounds = array<i64: 2, 1>, scalar_prefetch = 1 : i64, scratch_operands = 3 : i64, tpu.core_type = #tpu.core_type<tc>, window_params = [{transform_indices = @transform_0, window_bounds = array<i64: 1, 1, 8>}, {transform_indices = @transform_1, window_bounds = array<i64: 1, 10, 8>}, {transform_indices = @transform_2, window_bounds = array<i64: 1, 10, 4>}, {pipeline_mode = #tpu.pipeline_mode<synchronous>, transform_indices = @transform_3, window_bounds = array<i64: 1, 8>}, {transform_indices = @transform_4, window_bounds = array<i64: 1, 1, 4>}]} {
    %c0_i32 = arith.constant 0 : i32
    %0 = arith.cmpi eq, %arg1, %c0_i32 : i32
    %1 = arith.extui %0 : i1 to i32
    %c0_i32_0 = arith.constant 0 : i32
    %2 = arith.cmpi ne, %1, %c0_i32_0 : i32
    scf.if %2 {
      %cst_39 = arith.constant 0xFF800000 : f32
      %61 = vector.broadcast %cst_39 : f32 to vector<1x1x1xf32>
      %c0_40 = arith.constant 0 : index
      %c0_41 = arith.constant 0 : index
      %c0_42 = arith.constant 0 : index
      %62 = vector.load %arg8[%c0_40, %c0_41, %c0_42] : memref<1x1x1xf32, #tpu.memory_space<vmem>>, vector<1x1x1xf32>
      tpu.vector_store %arg8[%c0_40, %c0_41, %c0_42], %61 {strides = array<i32>} : memref<1x1x1xf32, #tpu.memory_space<vmem>>, vector<1x1x1xf32>,
      %cst_43 = arith.constant 0.000000e+00 : f32
      %63 = vector.broadcast %cst_43 : f32 to vector<1x1x1xf32>
      %c0_44 = arith.constant 0 : index
      %c0_45 = arith.constant 0 : index
      %c0_46 = arith.constant 0 : index
      %64 = vector.load %arg9[%c0_44, %c0_45, %c0_46] : memref<1x1x1xf32, #tpu.memory_space<vmem>>, vector<1x1x1xf32>
      tpu.vector_store %arg9[%c0_44, %c0_45, %c0_46], %63 {strides = array<i32>} : memref<1x1x1xf32, #tpu.memory_space<vmem>>, vector<1x1x1xf32>,
      %cst_47 = arith.constant 0.000000e+00 : f32
      %65 = vector.broadcast %cst_47 : f32 to vector<1x1x4xf32>
      %c0_48 = arith.constant 0 : index
      %c0_49 = arith.constant 0 : index
      %c0_50 = arith.constant 0 : index
      %66 = vector.load %arg10[%c0_48, %c0_49, %c0_50] : memref<1x1x4xf32, #tpu.memory_space<vmem>>, vector<1x1x4xf32>
      tpu.vector_store %arg10[%c0_48, %c0_49, %c0_50], %65 {strides = array<i32>} : memref<1x1x4xf32, #tpu.memory_space<vmem>>, vector<1x1x4xf32>,
    } else {
    }
    %c0 = arith.constant 0 : index
    %c0_1 = arith.constant 0 : index
    %c0_2 = arith.constant 0 : index
    %3 = vector.load %arg3[%c0, %c0_1, %c0_2] : memref<1x1x8xf32, #tpu.memory_space<vmem>>, vector<1x1x8xf32>
    %c0_3 = arith.constant 0 : index
    %c0_4 = arith.constant 0 : index
    %c0_5 = arith.constant 0 : index
    %4 = vector.load %arg4[%c0_3, %c0_4, %c0_5] : memref<1x10x8xf32, #tpu.memory_space<vmem>>, vector<1x10x8xf32>
    %c0_6 = arith.constant 0 : index
    %c0_7 = arith.constant 0 : index
    %c0_8 = arith.constant 0 : index
    %5 = vector.load %arg5[%c0_6, %c0_7, %c0_8] : memref<1x10x4xf32, #tpu.memory_space<vmem>>, vector<1x10x4xf32>
    %c0_9 = arith.constant 0 : index
    %c0_10 = arith.constant 0 : index
    %6 = vector.load %arg6[%c0_9, %c0_10] : memref<1x8xf32, #tpu.memory_space<vmem>>, vector<1x8xf32>
    %7 = vector.shape_cast %3 : vector<1x1x8xf32> to vector<1x1x1x8xf32>
    %8 = vector.shape_cast %4 : vector<1x10x8xf32> to vector<1x1x10x8xf32>
    %9 = vector.broadcast %7 : vector<1x1x1x8xf32> to vector<1x1x10x8xf32>
    %10 = arith.addf %9, %8 : vector<1x1x10x8xf32>
    %11 = math.tanh %10 : vector<1x1x10x8xf32>
    %12 = vector.shape_cast %6 : vector<1x8xf32> to vector<1x1x1x8xf32>
    %13 = vector.broadcast %12 : vector<1x1x1x8xf32> to vector<1x1x10x8xf32>
    %14 = arith.mulf %11, %13 : vector<1x1x10x8xf32>
    %cst = arith.constant dense<0.000000e+00> : vector<1x1x10xf32>
    %15 = vector.multi_reduction <add>, %14, %cst [3] : vector<1x1x10x8xf32> to vector<1x1x10xf32>
    %c1_i32 = arith.constant 1 : i32
    %16 = arith.muli %arg0, %c1_i32 : i32
    %c10_i32 = arith.constant 10 : i32
    %17 = arith.muli %arg1, %c10_i32 : i32
    %18 = tpu.iota {dimensions = array<i32: 2>} : vector<1x1x10xi32>
    %19 = vector.broadcast %17 : i32 to vector<1x1x10xi32>
    %20 = arith.addi %19, %18 : vector<1x1x10xi32>
    %21 = tpu.iota {dimensions = array<i32: 0>} : vector<1x1x10xi32>
    %c0_i32_11 = arith.constant 0 : i32
    %22 = vector.broadcast %c0_i32_11 : i32 to vector<1x1x10xi32>
    %c0_i32_12 = arith.constant 0 : i32
    %23 = vector.broadcast %c0_i32_12 : i32 to vector<1x1x10xi32>
    %24 = arith.cmpi eq, %21, %23 : vector<1x1x10xi32>
    %c0_i32_13 = arith.constant 0 : i32
    %25 = arith.addi %16, %c0_i32_13 : i32
    %26 = arith.index_cast %25 : i32 to index
    %27 = memref.load %arg2[%26] : memref<2xi32, #tpu.memory_space<smem>>
    %28 = vector.broadcast %27 : i32 to vector<1x1x10xi32>
    %29 = arith.select %24, %28, %22 : vector<1x1x10xi1>, vector<1x1x10xi32>
    %30 = arith.cmpi slt, %20, %29 : vector<1x1x10xi32>
    %c10_i32_14 = arith.constant 10 : i32
    %31 = vector.broadcast %c10_i32_14 : i32 to vector<1x1x10xi32>
    %32 = arith.cmpi slt, %20, %31 : vector<1x1x10xi32>
    %33 = arith.andi %30, %32 : vector<1x1x10xi1>
    %cst_15 = arith.constant -1.000000e+06 : f32
    %34 = vector.broadcast %cst_15 : f32 to vector<1x1x10xf32>
    %35 = arith.select %33, %15, %34 : vector<1x1x10xi1>, vector<1x1x10xf32>
    %c0_16 = arith.constant 0 : index
    %c0_17 = arith.constant 0 : index
    %c0_18 = arith.constant 0 : index
    %36 = vector.load %arg8[%c0_16, %c0_17, %c0_18] : memref<1x1x1xf32, #tpu.memory_space<vmem>>, vector<1x1x1xf32>
    %cst_19 = arith.constant dense<0xFF800000> : vector<1x1xf32>
    %37 = vector.multi_reduction <maximumf>, %35, %cst_19 [2] : vector<1x1x10xf32> to vector<1x1xf32>
    %38 = vector.shape_cast %37 : vector<1x1xf32> to vector<1x1x1xf32>
    %39 = arith.maximumf %36, %38 : vector<1x1x1xf32>
    %40 = arith.subf %36, %39 : vector<1x1x1xf32>
    %41 = math.exp %40 : vector<1x1x1xf32>
    %42 = vector.broadcast %39 : vector<1x1x1xf32> to vector<1x1x10xf32>
    %43 = arith.subf %35, %42 : vector<1x1x10xf32>
    %44 = math.exp %43 : vector<1x1x10xf32>
    %c0_20 = arith.constant 0 : index
    %c0_21 = arith.constant 0 : index
    %c0_22 = arith.constant 0 : index
    %45 = vector.load %arg9[%c0_20, %c0_21, %c0_22] : memref<1x1x1xf32, #tpu.memory_space<vmem>>, vector<1x1x1xf32>
    %46 = arith.mulf %41, %45 : vector<1x1x1xf32>
    %cst_23 = arith.constant dense<0.000000e+00> : vector<1x1xf32>
    %47 = vector.multi_reduction <add>, %44, %cst_23 [2] : vector<1x1x10xf32> to vector<1x1xf32>
    %48 = vector.shape_cast %47 : vector<1x1xf32> to vector<1x1x1xf32>
    %49 = arith.addf %46, %48 : vector<1x1x1xf32>
    %c0_24 = arith.constant 0 : index
    %c0_25 = arith.constant 0 : index
    %c0_26 = arith.constant 0 : index
    %50 = vector.load %arg9[%c0_24, %c0_25, %c0_26] : memref<1x1x1xf32, #tpu.memory_space<vmem>>, vector<1x1x1xf32>
    tpu.vector_store %arg9[%c0_24, %c0_25, %c0_26], %49 {strides = array<i32>} : memref<1x1x1xf32, #tpu.memory_space<vmem>>, vector<1x1x1xf32>,
    %c0_27 = arith.constant 0 : index
    %c0_28 = arith.constant 0 : index
    %c0_29 = arith.constant 0 : index
    %51 = vector.load %arg10[%c0_27, %c0_28, %c0_29] : memref<1x1x4xf32, #tpu.memory_space<vmem>>, vector<1x1x4xf32>
    %52 = vector.broadcast %41 : vector<1x1x1xf32> to vector<1x1x4xf32>
    %53 = arith.mulf %52, %51 : vector<1x1x4xf32>
    "tpu.trace_start"() <{level = 10 : i32, message = "bqk,bkd->bqd"}> : () -> ()
    %cst_30 = arith.constant dense<0.000000e+00> : vector<1x1x4xf32>
    %54 = tpu.matmul %44, %5, %cst_30 {dimension_numbers = #tpu.dot_dimension_numbers<[2], [1], [1], [2], [0, 0, 0, 1, 1, 2], [0], [0]>} : vector<1x1x10xf32>, vector<1x10x4xf32>, vector<1x1x4xf32> -> vector<1x1x4xf32>
    "tpu.trace_stop"() : () -> ()
    %55 = arith.addf %53, %54 : vector<1x1x4xf32>
    %c0_31 = arith.constant 0 : index
    %c0_32 = arith.constant 0 : index
    %c0_33 = arith.constant 0 : index
    %56 = vector.load %arg10[%c0_31, %c0_32, %c0_33] : memref<1x1x4xf32, #tpu.memory_space<vmem>>, vector<1x1x4xf32>
    tpu.vector_store %arg10[%c0_31, %c0_32, %c0_33], %55 {strides = array<i32>} : memref<1x1x4xf32, #tpu.memory_space<vmem>>, vector<1x1x4xf32>,
    %c0_34 = arith.constant 0 : index
    %c0_35 = arith.constant 0 : index
    %c0_36 = arith.constant 0 : index
    %57 = vector.load %arg8[%c0_34, %c0_35, %c0_36] : memref<1x1x1xf32, #tpu.memory_space<vmem>>, vector<1x1x1xf32>
    tpu.vector_store %arg8[%c0_34, %c0_35, %c0_36], %39 {strides = array<i32>} : memref<1x1x1xf32, #tpu.memory_space<vmem>>, vector<1x1x1xf32>,
    %c0_i32_37 = arith.constant 0 : i32
    %58 = arith.cmpi eq, %arg1, %c0_i32_37 : i32
    %59 = arith.extui %58 : i1 to i32
    %c0_i32_38 = arith.constant 0 : i32
    %60 = arith.cmpi ne, %59, %c0_i32_38 : i32
    scf.if %60 {
      %c0_39 = arith.constant 0 : index
      %c0_40 = arith.constant 0 : index
      %c0_41 = arith.constant 0 : index
      %61 = vector.load %arg9[%c0_39, %c0_40, %c0_41] : memref<1x1x1xf32, #tpu.memory_space<vmem>>, vector<1x1x1xf32>
      %62 = tpu.reciprocal %61 {approx = true} : vector<1x1x1xf32> -> vector<1x1x1xf32>
      %63 = arith.mulf %61, %62 : vector<1x1x1xf32>
      %cst_42 = arith.constant 2.000000e+00 : f32
      %64 = vector.broadcast %cst_42 : f32 to vector<1x1x1xf32>
      %65 = arith.subf %64, %63 : vector<1x1x1xf32>
      %66 = arith.mulf %62, %65 : vector<1x1x1xf32>
      %c0_43 = arith.constant 0 : index
      %c0_44 = arith.constant 0 : index
      %c0_45 = arith.constant 0 : index
      %67 = vector.load %arg10[%c0_43, %c0_44, %c0_45] : memref<1x1x4xf32, #tpu.memory_space<vmem>>, vector<1x1x4xf32>
      %68 = vector.broadcast %66 : vector<1x1x1xf32> to vector<1x1x4xf32>
      %69 = arith.mulf %67, %68 : vector<1x1x4xf32>
      %c0_46 = arith.constant 0 : index
      %c0_47 = arith.constant 0 : index
      %c0_48 = arith.constant 0 : index
      %70 = vector.load %arg7[%c0_46, %c0_47, %c0_48] : memref<1x1x4xf32, #tpu.memory_space<vmem>>, vector<1x1x4xf32>
      tpu.vector_store %arg7[%c0_46, %c0_47, %c0_48], %69 {strides = array<i32>} : memref<1x1x4xf32, #tpu.memory_space<vmem>>, vector<1x1x4xf32>,
    } else {
    }
    return
  }
  func.func @transform_0(%arg0: i32, %arg1: i32, %arg2: memref<2xi32, #tpu.memory_space<smem>>) -> (i32, i32, i32) {
    %c0_i32 = arith.constant 0 : i32
    %c0_i32_0 = arith.constant 0 : i32
    %c0_i32_1 = arith.constant 0 : i32
    return %arg0, %c0_i32, %c0_i32_0 : i32, i32, i32
  }
  func.func @transform_1(%arg0: i32, %arg1: i32, %arg2: memref<2xi32, #tpu.memory_space<smem>>) -> (i32, i32, i32) {
    %c0_i32 = arith.constant 0 : i32
    %c0_i32_0 = arith.constant 0 : i32
    return %arg0, %arg1, %c0_i32 : i32, i32, i32
  }
  func.func @transform_2(%arg0: i32, %arg1: i32, %arg2: memref<2xi32, #tpu.memory_space<smem>>) -> (i32, i32, i32) {
    %c0_i32 = arith.constant 0 : i32
    %c0_i32_0 = arith.constant 0 : i32
    return %arg0, %arg1, %c0_i32 : i32, i32, i32
  }
  func.func @transform_3(%arg0: i32, %arg1: i32, %arg2: memref<2xi32, #tpu.memory_space<smem>>) -> (i32, i32) {
    %c0_i32 = arith.constant 0 : i32
    %c0_i32_0 = arith.constant 0 : i32
    %c0_i32_1 = arith.constant 0 : i32
    return %c0_i32, %c0_i32_0 : i32, i32
  }
  func.func @transform_4(%arg0: i32, %arg1: i32, %arg2: memref<2xi32, #tpu.memory_space<smem>>) -> (i32, i32, i32) {
    %c0_i32 = arith.constant 0 : i32
    %c0_i32_0 = arith.constant 0 : i32
    %c0_i32_1 = arith.constant 0 : i32
    return %arg0, %c0_i32, %c0_i32_0 : i32, i32, i32
  }
}

</mosaic_0001>

<bundles_post_ra>
// kernel: tpu_custom_call.1
= control target key start
LH: loop header
LB: loop body
LE: loop exit
PB: predicated region body
PF: predicated region fallthrough
CT: control target
= control target key end

     0   :  { %s977_s0 = inlined_call_operand.vmem [shape: s32[2], index: 0, kind: input, shape index: {}]   ;;  %s978_s1 = inlined_call_operand.vmem [shape: f32[2,1,8], index: 1, kind: input, shape index: {}]   ;;  %s979_s2 = inlined_call_operand.vmem [shape: f32[2,10,8], index: 2, kind: input, shape index: {}]   ;;  %s980_s3 = inlined_call_operand.vmem [shape: f32[2,10,4], index: 3, kind: input, shape index: {}]   ;;  %s981_s4 = inlined_call_operand.vmem [shape: f32[1,8], index: 4, kind: input, shape index: {}]   ;;  %s982_s5 = inlined_call_operand.hbm [shape: f32[2,1,4], index: 5, kind: output, shape index: {}]  }
   0x1   :  { %s10_s20 = sshll.u32 %s977_s0, 4  ;;  %s11_s20 = int_to_ptr.vmem [resolvable:$true] %s10_s20 }
   0x2   :  { %s703_s21 = scalar_lea.vmem %s11_s20, 16  ;;  %p708_p1 = scmp.lt.s32.totalorder %s11_s20, %s11_s20 }
   0x3   :  { %p704_p0 = scmp.ne.s32.totalorder %s11_s20, %s703_s21  ;;  %p709_p2 = scmp.lt.s32.totalorder %s703_s21, %s703_s21 }
   0x5   :  { %p710_p3 = por %p709_p2, %p708_p1 }
   0x7   :  { %p711_p4 = pnand %p710_p3, %p704_p0 }
   0x9   :  { %714 = shalt.err (!%p711_p4)  }
   0xa   :  { %s797_s22 = smov [#allocation6]  }
   0xb   :  { %13 = dma.vmem_to_smem %s11_s20, 16, %s797_s22, [#allocation5] }
   0xc   :  { %767 = dma.done.wait [#allocation5], 16 }
   0xd   :  { %768 = vsyncadd [#allocation5], 4294967280 }
   0xe   :  { %15 = sfence }
   0xf   :  { %16 = vsyncpa [#allocation8], 0 }
  0x10   :  { %18 = vsyncpa [#allocation8 + $0x1], 0  ;;  %s838_s23 = smov 0   ;;  %s840_s24 = smov 0  }
  0x11   :  { %s842_s0 = smov 0   ;;  %s844_s25 = smov 0  }
  0x12   :  { %s846_s26 = smov 0   ;;  %s848_s27 = smov 0  }
  0x13 LB: > { %s597_s28 = sadd.s32 4294967295, %s795_s27   ;;  %s598_s29 = sadd.s32 4294967294, %s795_s27   ;;  %s795_s27 = sphi %s848_s27, %s24_s27   ;;  %s791_s26 = sphi %s846_s26, %s989_s26   ;;  %s787_s25 = sphi %s844_s25, %s988_s25   ;;  %s783_s0 = sphi %s842_s0, %s987_s0   ;;  %s779_s24 = sphi %s840_s24, %s986_s24   ;;  %s775_s23 = sphi %s838_s23, %s985_s23  }
  0x14   : > { %s36_s30 = sadd.s32 1, %s791_s26  ;;  %s146_s6 = sadd.s32 1, %s783_s0 }
  0x15   : > { %p38_p5 = scmp.ge.s32.totalorder %s36_s30, 2  ;;  %p156_p6 = scmp.ne.s32.totalorder %s783_s0, %s779_s24 }
  0x16   : > { %p157_p7 = scmp.eq.s32.totalorder %s597_s28, 1  ;;  %p162_p8 = scmp.ne.s32.totalorder %s779_s24, %s775_s23 }
  0x17   : > { %s991_s30 = smov (%p38_p5, %s36_s30), 0  ;;  %p163_p10 = scmp.eq.s32.totalorder %s598_s29, 1 }
  0x18   : > { %p878_p9 = por %p157_p7, %p156_p6  ;;  %s143_s8 = ssub.s32 %s791_s26, %s991_s30 }
  0x19   : > { %p601_p11 = scmp.ge.s32.totalorder %s795_s27, 1  ;;  %p144_p12 = scmp.eq.s32.totalorder %s143_s8, 0 }
  0x1a   : > { %p885_p13 = por %p163_p10, %p162_p8  ;;  %p216_p0 = scmp.lt.s32.totalorder %s795_s27, 3 }
  0x1b   : > { %s891_s10 = scalar_select %p144_p12, %s783_s0, %s146_s6  }
  0x1c   : > { %p217_p1 = pnand %p601_p11, %p216_p0 }
  0x1d   : > { %p257_p2 = scmp.lt.s32.totalorder (!%p217_p1), %s787_s25, 1  ;;  %v607_v5 = vld [vmem:[%s981_s4] ss:$0 sm:$0xff] (!%p217_p1)  ;;  %vm313_vm0 = vcmask (!%p217_p1), 64512   ;;  %vm317_vm1 = vcmask (!%p217_p1), 58368   ;;  %vm284_vm2 = vcmask (!%p217_p1), 0   ;;  %v322_v13 = vlaneseq (!%p217_p1) }
  0x1e   : > { %220 = sbr.rel (%p217_p1) target bundleno = 814 (0x32e), region = 36  ;;  %v798_v12 = vmov (!%p217_p1), -inf   ;;  %s326_s21 = sld [smem:[#allocation6 + %s787_s25]] (!%p217_p1)  ;;  %vm342_vm5 = vcmask (!%p217_p1), 130112   ;;  %vm347_vm7 = vcmask (!%p217_p1), 73728   ;;  %v799_v27 = vmov (!%p217_p1), 0  }
  0x1f   : > { %285 = vst.msk [vmem:[#allocation2] sm:$0x1] (!%p217_p1), %vm284_vm2, %v798_v12  ;;  %v323_v14 = vand.u32 (!%p217_p1), 127, %v322_v13  ;;  %v334_v15 = vshrl.u32 (!%p217_p1), %v322_v13, 7  ;;  %691 = vset.pattern.permute.xlu1 (!%p217_p1), %v799_v27  ;;  %692 = vset.pattern.permute.xlu0 (!%p217_p1), %v799_v27  ;;  %v800_v28 = vmov (!%p217_p1), 0.0   ;;  %vm390_vm8 = vcmask (!%p217_p1), 1041408  }
  0x20   : > { %286 = vst.msk [vmem:[#allocation3] sm:$0x1] (!%p217_p1), %vm284_vm2, %v800_v28  ;;  %vm287_vm9 = vcmask (!%p217_p1), 24576   ;;  %v801_v33 = vmov (!%p217_p1), 0.0|0.0   ;;  %vm802_vm10 = vmmov (!%p217_p1), 1   ;;  %vm803_vm12 = vmmov (!%p217_p1), 0  }
  0x21   : > { %v337_v16 = vadd.s32 (!%p217_p1), 4294967288, %v323_v14  ;;  %v335_v19 = vsub.s32 (!%p217_p1), %v323_v14, %v334_v15  ;;  %vm329_vm4 = vcmp.lt.s32.totalorder (!%p217_p1), %v323_v14, 10  ;;  %625 = vmatprep.subr.bf16.mxu0 (!%p217_p1), %v801_v33  ;;  %vm627_vm11 = vmpackc.low (!%p217_p1), %vm390_vm8, %vm802_vm10  ;;  %288 = vst.msk [vmem:[#allocation4] sm:$0x1] (!%p217_p1), %vm287_vm9, %v800_v28  ;;  %622 = vmatprep.mubr.msk.f32.mxu0 (!%p217_p1), %vm803_vm12, %v800_v28  ;;  %v362_v37 = vsub.s32 (!%p217_p1), 0, %v334_v15  ;;  %s255_s6 = sand.u32 (!%p217_p1), 1, %s779_s24  }
  0x22   : > { %vm386_vm13 = vcmask (!%p217_p1), 80896   ;;  %s610_s8 = sshll.u32 (!%p217_p1), %s787_s25, 4  ;;  %s489_s16 = scalar_lea.sflag (!%p217_p1), [#allocation8], %s255_s6 }
  0x23   : > { %v340_v20 = vsub.s32 (!%p217_p1), %v337_v16, %v334_v15 }
  0x24   : > { %v327_v17 = vstv (!%p217_p1), %s326_s21 }
  0x25   : > { %s895_s11 = scalar_select %p257_p2, %s787_s25, 1  ;;  %vm328_vm3 = vcmp.lt.s32.totalorder %v323_v14, %v327_v17 }
  0x26   : > { %vm330_vm6 = vmand %vm328_vm3, %vm329_vm4  ;;  %v346_v29 = vld [vmem:[#allocation2] sm:$0x1]  ;;  %s804_s25 = smov [#allocation7]  }
  0x27   : > { %s259_s14 = scalar_lea.vmem %s978_s1, %s895_s11  ;;  %s613_s15 = sshll.u32 %s895_s11, 4  ;;  %v367_v46 = vld [vmem:[#allocation3] sm:$0x1] }
  0x28   : > { %s268_s18 = scalar_lea.vmem %s979_s2, %s613_s15  ;;  %v606_v0 = vld [vmem:[%s259_s14] ss:$0 sm:$0xff]  ;;  %s278_s29 = scalar_lea.vmem %s980_s3, %s613_s15  ;;  %v375_v57 = vld [vmem:[#allocation4] sm:$0x1] }
  0x29   : > { %v290_v1 = vld [vmem:[%s268_s18] sm:$0xff]  ;;  %v291_v2 = vld [vmem:[%s268_s18 + $0x8] sm:$0x3]  ;;  %s256_s11 = scalar_lea.vmem [#allocation7], %s255_s6  ;;  %s929_s15 = scalar_lea.hbm %s982_s5, %s610_s8 }
  0x2a   : > { %v301_v3 = vadd.f32 %v606_v0, %v290_v1  ;;  %v302_v4 = vadd.f32 %v606_v0, %v291_v2  ;;  %v292_v34 = vld [vmem:[%s278_s29] sm:$0xff]  ;;  %v293_v35 = vld [vmem:[%s278_s29 + $0x8] sm:$0x3]  ;;  %s501_s12 = sshll.u32 %s256_s11, 4  ;;  %s719_s18 = sshll.u32 %s804_s25, 4  ;;  %s931_s12 = int_to_ptr.vmem [resolvable:$true] %s501_s12  ;;  %s720_s18 = int_to_ptr.vmem [resolvable:$false] %s719_s18 }
  0x2b   : > { %v626_v36 = vpack.c.bf16 %v293_v35, %v292_v34  ;;  %s715_s17 = scalar_lea.vmem %s931_s12, 16  ;;  %s721_s19 = scalar_lea.vmem %s720_s18, 32 }
  0x2c   : > { %693 = vtanh.f32 %v301_v3  ;;  %p716_p3 = scmp.ne.s32.totalorder %s931_s12, %s715_s17  ;;  %p722_p6 = scmp.lt.s32.totalorder %s931_s12, %s720_s18 }
  0x2d   : > { %695 = vtanh.f32 %v302_v4  ;;  %628 = vmatpush3.bf16.msk.msra.mxu0 %vm627_vm11, %v626_v36  ;;  %p723_p7 = scmp.lt.s32.totalorder %s721_s19, %s715_s17 }
  0x2e   : > { %p717_p4 = pnand %p716_p3, %p878_p9 }
  0x2f   : > { %p724_p8 = por %p723_p7, %p722_p6 }
  0x30   : > { %p718_p5 = pneg %p717_p4 }
  0x32   : > { %p725_p10 = pnand %p724_p8, %p718_p5 }
  0x36   : > { %v694_v6 = vpop.eup %693 }
  0x37   : > { %v696_v7 = vpop.eup %695  ;;  %v311_v8 = vmul.f32 %v694_v6, %v607_v5 }
  0x38   : > { %v312_v9 = vmul.f32 %v696_v7, %v607_v5 }
  0x39   : > { %v314_v10 = vsel %vm313_vm0, %v311_v8, 0.0 }
  0x3a   : > { %315 = vadd.xlane.f32.xlu0 %v314_v10  ;;  %v318_v11 = vsel %vm317_vm1, %v312_v9, 0.0 }
  0x3e   : > { %319 = vadd.xlane.f32.xlu0 %v318_v11 }
  0xc7   : > { %v316_v18 = vpop.xlane.xlu0 %315 }
  0xc8   : > { %v336_v22 = vrot.slane %v316_v18, %v335_v19 }
  0xcb   : > { %v320_v21 = vpop.xlane.xlu0 %319 }
  0xcc   : > { %v341_v23 = vrot.slane %v320_v21, %v340_v20 }
  0xce   : > { %v343_v24 = vsel %vm342_vm5, %v341_v23, %v336_v22 }
  0xcf   : > { %v345_v25 = vsel %vm330_vm6, %v343_v24, -1000000.0 }
  0xd0   : > { %v348_v26 = vsel %vm347_vm7, %v345_v25, -inf }
  0xd1   : > { %349 = vmax.xlane.f32.xlu1 %v348_v26 }
 0x15e   : > { %v350_v30 = vpop.xlane.xlu1 %349 }
 0x15f   : > { %v351_v31 = vmax.f32 %v346_v29, %v350_v30 }
 0x161   : > { %v352_v32 = vsub.f32 %v346_v29, %v351_v31  ;;  %467 = vst.msk [vmem:[#allocation2] sm:$0x1] %vm284_vm2, %v351_v31  ;;  %357 = vperm.xlu1 %691, %v351_v31  }
 0x163   : > { %v353_v44 = vmul.f32 1.442695, %v352_v32 }
 0x1e0   : > { %v358_v38 = vpop.permute.xlu1 %357 }
 0x1e1   : > { %v363_v39 = vrot.slane %v358_v38, %v362_v37 }
 0x1e3   : > { %v364_v40 = vsub.f32 %v345_v25, %v363_v39 }
 0x1e5   : > { %v365_v41 = vmul.f32 1.442695, %v364_v40 }
 0x1e7   : > { %697 = vpow2.f32 %v365_v41 }
 0x1e8   : > { %699 = vpow2.f32 %v353_v44 }
 0x1f1   : > { %v698_v42 = vpop.eup %697 }
 0x1f2   : > { %623 = vmatmul.mubr.msk.f32.vlgmr.msra.gmra.mrb[0].mxu0 %vm386_vm13, %v698_v42  ;;  %v369_v43 = vsel %vm347_vm7, %v698_v42, 0.0  ;;  %v700_v45 = vpop.eup %699 }
 0x1f3   : > { %370 = vadd.xlane.f32.xlu0 %v369_v43  ;;  %v368_v47 = vmul.f32 %v700_v45, %v367_v46 }
 0x209   : > { %378 = vperm.xlu0 %692, %v700_v45  }
 0x280   : > { %v371_v48 = vpop.xlane.xlu0 %370 }
 0x281   : > { %v372_v49 = vadd.f32 %v371_v48, %v368_v47 }
 0x283   : > { %374 = vst.msk [vmem:[#allocation3] sm:$0x1] %vm284_vm2, %v372_v49 }
 0x288   : > { %v379_v55 = vpop.permute.xlu0 %378 }
 0x289   : > { %v384_v56 = vrot.slane %v379_v55, %v362_v37 }
 0x28a   : > { %v471_v50 = vld [vmem:[#allocation3] sm:$0x1] }
 0x28b   : > { %701 = vrcp.f32 %v471_v50  ;;  %v385_v58 = vmul.f32 %v384_v56, %v375_v57 }
 0x295   : > { %v702_v51 = vpop.eup %701 }
 0x296   : > { %v473_v52 = vmul.f32 %v702_v51, %v471_v50 }
 0x298   : > { %v474_v53 = vsub.f32 2.0, %v473_v52 }
 0x29a   : > { %v475_v54 = vmul.f32 %v702_v51, %v474_v53 }
 0x29c   : > { %479 = vperm.xlu1 %691, %v475_v54  }
 0x2c5   : > { %v460_v59 = vpop.f32.mrb[0].mxu0 }
 0x2c6   : > { %v464_v60 = vadd.f32 %v460_v59, %v385_v58  ;;  %v624_v61 = vpop.f32.mrb[1].mxu0 }
 0x2c8   : > { %466 = vst.msk [vmem:[#allocation4] sm:$0x1] %vm287_vm9, %v464_v60 }
 0x2cf   : > { %v476_v0 = vld [vmem:[#allocation4] sm:$0x1] }
 0x31b   : > { %v480_v62 = vpop.permute.xlu1 %479 }
 0x31c   : > { %v485_v63 = vrot.slane %v480_v62, %v362_v37 }
 0x31e   : > { %v486_v1 = vmul.f32 %v485_v63, %v476_v0 }
 0x320   : > { %487 = vst.msk [vmem:[%s256_s11] sm:$0x1] %vm287_vm9, %v486_v1 }
 0x321   : > { %728 = shalt.err (!%p725_p10)
}
 0x322   : > { %s729_s20 = scalar_lea.hbm %s929_s15, 16  ;;  %s733_s28 = scalar_lea.hbm %s982_s5, 32 }
 0x323   : > { %p730_p11 = scmp.ne.s32.totalorder %s929_s15, %s729_s20  ;;  %p734_p1 = scmp.lt.u32.totalorder %s929_s15, %s982_s5 }
 0x324   : > { %p735_p2 = scmp.lt.u32.totalorder %s733_s28, %s729_s20  ;;  %p737_p4 = scmp.lt.u32.totalorder %s729_s20, %s929_s15 }
 0x325   : > { %p731_p12 = pnand %p730_p11, %p878_p9 }
 0x326   : > { %p736_p3 = por %p735_p2, %p734_p1 }
 0x327   : > { %p732_p0 = pneg %p731_p12 }
 0x328   : > { %p738_p5 = por %p737_p4, %p736_p3 }
 0x32a   : > { %p739_p6 = pnand %p738_p5, %p732_p0 }
 0x32c   : > { %742 = shalt.err (!%p739_p6)
}
 0x32d   : > { %629 = dma.vmem_to_hbm [thread:$0]  (%p878_p9), %s931_s12, 16, %s929_s15, %s489_s16  }
 0x32e PF: > { %p635_p7 = scmp.ge.s32.totalorder %s795_s27, 2  ;;  %s513_s8 = sand.u32 1, %s775_s23  }
 0x32f   : > { %s514_s11 = scalar_lea.sflag [#allocation8], %s513_s8 }
 0x330   : > { %p632_p8 = pnand %p635_p7, %p885_p13 }
 0x332   : > { %770 = dma.done.wait (!%p632_p8), %s514_s11, 16  }
 0x333   : > { %772 = vsyncadd (!%p632_p8), %s514_s11, 4294967280  ;;  %s24_s27 = sadd.s32 1, %s795_s27   ;;  %s985_s23 = smov %s779_s24 }
 0x334   : > { %p21_p10 = scmp.ge.s32.totalorder %s24_s27, 4   ;;  %s986_s24 = smov %s783_s0 }
 0x335   : > { %s987_s0 = smov %s891_s10  ;;  %s988_s25 = smov %s791_s26 }
 0x336   : > { %s989_s26 = smov %s991_s30  ;;  %23 = sbr.rel (!%p21_p10) target bundleno = 19 (0x13), region = 85 }
 0x33d   :  { %518 = vsyncpa [#allocation8], 1 }
 0x33e   :  { %520 = vsyncpa [#allocation8 + $0x1], 1 }

</bundles_post_ra>
